<compile_context>
chip_gen: v7x
topology: tpu7x:2x2x1
jax: 0.10.0
libtpu: 0.0.40
codegen_flags: <defaults>
</compile_context>

<pallas_src>
import functools

import jax
import jax.numpy as jnp
from jax import lax
from jax.experimental import pallas as pl
from jax.experimental.pallas import tpu as pltpu

_BIG = 2 ** 30                      # "no candidate yet" index sentinel
_TARGET_TILE_BYTES = 4 * 1024 * 1024


def _argmax_kernel(x_ref, o_ref, max_sc, arg_sc, nan_sc, *, n, is_float):
    """Online argmax over lanes; grid = (row blocks, K blocks)."""
    k = pl.program_id(1)
    nk = pl.num_programs(1)
    tm, tk = x_ref.shape
    acc_dtype = max_sc.dtype
    if is_float:
        neg = jnp.array(-jnp.inf, acc_dtype)
    else:
        neg = jnp.array(jnp.iinfo(acc_dtype).min, acc_dtype)

    @pl.when(k == 0)
    def _init():
        max_sc[...] = jnp.full((tm, 1), neg, acc_dtype)
        arg_sc[...] = jnp.full((tm, 1), _BIG, jnp.int32)
        nan_sc[...] = jnp.full((tm, 1), _BIG, jnp.int32)

    x = x_ref[...].astype(acc_dtype)
    col = k * tk + lax.broadcasted_iota(jnp.int32, (tm, tk), 1)
    valid = col < n                        # masks the ragged last K block

    if is_float:
        # NaN dominates (torch.argmax semantics): track the first NaN index.
        isn = jnp.isnan(x) & valid
        nan_idx = jnp.min(jnp.where(isn, col, _BIG), axis=-1, keepdims=True)
        nan_sc[...] = jnp.minimum(nan_sc[...], nan_idx)
        fin = valid & jnp.logical_not(isn)
    else:
        fin = valid

    xm = jnp.where(fin, x, neg)
    blk_max = jnp.max(xm, axis=-1, keepdims=True)
    blk_arg = jnp.min(jnp.where(fin & (xm == blk_max), col, _BIG),
                      axis=-1, keepdims=True)

    # Merge block result into the running (value desc, index asc) accumulator.
    cur_max = max_sc[...]
    cur_arg = arg_sc[...]
    take = (blk_max > cur_max) | ((blk_max == cur_max) & (blk_arg < cur_arg))
    max_sc[...] = jnp.where(take, blk_max, cur_max)
    arg_sc[...] = jnp.where(take, blk_arg, cur_arg)

    @pl.when(k == nk - 1)
    def _finalize():
        res = arg_sc[...]
        if is_float:
            res = jnp.where(nan_sc[...] < _BIG, nan_sc[...], res)
        o_ref[...] = res


def _round_down_8(v):
    return max(8, (v // 8) * 8)


def _pick_tiles(m, n, itemsize, block_rows, block_cols):
    # --- K tile (lanes) ------------------------------------------------------
    if block_cols is not None:
        tk = int(block_cols)
        tk = n if tk >= n else max(128, (tk // 128) * 128)
    elif n * itemsize * 256 <= _TARGET_TILE_BYTES:
        tk = n                                     # whole reduction axis fits
    else:
        tk = (_TARGET_TILE_BYTES // (256 * itemsize)) // 128 * 128
        tk = max(128, min(tk, (n // 128) * 128))

    # --- row tile (sublanes) -------------------------------------------------
    if block_rows is not None:
        tm = max(1, min(int(block_rows), m))
        if tm < m:
            tm = _round_down_8(tm)
    elif m <= 8:
        tm = m                                     # full dim, tiny problem
    else:
        tm = min(_TARGET_TILE_BYTES // max(1, tk * itemsize), 2048, m)
        if m >= 16:
            tm = min(tm, m // 2)                   # >=2 row blocks -> megacore
        tm = _round_down_8(tm)
        if m % tm != 0:                            # prefer a divisor if nearby
            for t in range(tm, max(7, tm // 2), -8):
                if m % t == 0:
                    tm = t
                    break
    return tm, tk


def argmax_last_dim(x, *, block_rows=None, block_cols=None):
    """argmax over the last axis of x, returning int32 indices."""
    lead_shape = x.shape[:-1]
    n = int(x.shape[-1])
    m = 1
    for d in lead_shape:
        m *= int(d)
    if m == 0:
        return jnp.zeros(lead_shape, jnp.int32)

    x2 = x.reshape(m, n)
    itemsize = jnp.dtype(x.dtype).itemsize
    is_float = bool(jnp.issubdtype(x.dtype, jnp.floating))
    acc_dtype = jnp.float32 if is_float else jnp.int32

    tm, tk = _pick_tiles(m, n, itemsize, block_rows, block_cols)
    grid = (pl.cdiv(m, tm), pl.cdiv(n, tk))

    # VMEM: double-buffered input tiles + (lane-padded) output + scratch.
    need = 2 * tm * tk * itemsize + 2 * tm * 128 * 4 + 3 * tm * 128 * 4
    vmem_limit = int(min(48 * 1024 * 1024, max(32 * 1024 * 1024, 2 * need)))

    kernel = functools.partial(_argmax_kernel, n=n, is_float=is_float)

    out = pl.pallas_call(
        kernel,
        out_shape=jax.ShapeDtypeStruct((m, 1), jnp.int32),
        grid_spec=pltpu.PrefetchScalarGridSpec(
            num_scalar_prefetch=0,
            grid=grid,
            in_specs=[pl.BlockSpec((tm, tk), lambda i, k: (i, k))],
            out_specs=pl.BlockSpec((tm, 1), lambda i, k: (i, 0)),
            scratch_shapes=[
                pltpu.VMEM((tm, 1), acc_dtype),    # running max
                pltpu.VMEM((tm, 1), jnp.int32),    # running argmax index
                pltpu.VMEM((tm, 1), jnp.int32),    # first-NaN index
            ],
        ),
        compiler_params=pltpu.CompilerParams(
            dimension_semantics=("parallel", "arbitrary"),
            vmem_limit_bytes=vmem_limit,
        ),
    )(x2)

    return out.reshape(lead_shape)


def _reference(x):
    return jnp.argmax(x, axis=-1).astype(jnp.int32)


if __name__ == "__main__":
    # 1) GAN feature-map-like shape: (batch, channels, H, W).
    x = jax.random.normal(jax.random.PRNGKey(0), (2, 4, 16, 16),
                          dtype=jnp.float32)
    idx = argmax_last_dim(x)
    jax.block_until_ready(idx)
    ref = _reference(x)
    assert idx.shape == ref.shape, (idx.shape, ref.shape)
    assert bool(jnp.all(idx == ref)), "argmax mismatch vs reference (test 1)"

    # 2) Exercise the K-tiled online-accumulator path (forced small tiles).
    x2 = jax.random.normal(jax.random.PRNGKey(1), (4, 8, 384),
                           dtype=jnp.bfloat16)
    idx2 = argmax_last_dim(x2, block_rows=16, block_cols=128)
    jax.block_until_ready(idx2)
    ref2 = _reference(x2)
    assert bool(jnp.all(idx2 == ref2)), "argmax mismatch vs reference (test 2)"

    # 3) NaN handling: a row containing NaN returns the first NaN's index.
    x3 = jax.random.normal(jax.random.PRNGKey(2), (8, 64), dtype=jnp.float32)
    x3 = x3.at[3, 17].set(jnp.nan)
    idx3 = argmax_last_dim(x3)
    jax.block_until_ready(idx3)
    ref3 = _reference(x3)
    assert int(idx3[3]) == 17, "NaN row should return the NaN's index"
    other = jnp.arange(8) != 3
    assert bool(jnp.all(jnp.where(other, idx3 == ref3, True))), \
        "argmax mismatch vs reference (test 3)"

    print("KERNEL_OK")
</pallas_src>

<mosaic_0001>
module attributes {stable_mosaic.version = 11 : i64} {
  func.func @_argmax_kernel(%arg0: i32, %arg1: i32, %arg2: memref<64x16xf32, #tpu.memory_space<vmem>>, %arg3: memref<64x1xi32, #tpu.memory_space<vmem>>, %arg4: memref<64x1xf32, #tpu.memory_space<vmem>>, %arg5: memref<64x1xi32, #tpu.memory_space<vmem>>, %arg6: memref<64x1xi32, #tpu.memory_space<vmem>>) attributes {dimension_semantics = [#tpu.dimension_semantics<parallel>, #tpu.dimension_semantics<arbitrary>], iteration_bounds = array<i64: 2, 1>, scalar_prefetch = 0 : i64, scratch_operands = 3 : i64, tpu.core_type = #tpu.core_type<tc>, window_params = [{transform_indices = @transform_0, window_bounds = array<i64: 64, 16>}, {transform_indices = @transform_1, window_bounds = array<i64: 64, 1>}]} {
    %c0_i32 = arith.constant 0 : i32
    %0 = arith.cmpi eq, %arg1, %c0_i32 : i32
    %1 = arith.extui %0 : i1 to i32
    %cst = arith.constant 0xFF800000 : f32
    %c0_i32_0 = arith.constant 0 : i32
    %2 = arith.cmpi ne, %1, %c0_i32_0 : i32
    scf.if %2 {
      %46 = vector.broadcast %cst : f32 to vector<64x1xf32>
      %c0_23 = arith.constant 0 : index
      %c0_24 = arith.constant 0 : index
      %47 = vector.load %arg4[%c0_23, %c0_24] : memref<64x1xf32, #tpu.memory_space<vmem>>, vector<64x1xf32>
      tpu.vector_store %arg4[%c0_23, %c0_24], %46 {strides = array<i32>} : memref<64x1xf32, #tpu.memory_space<vmem>>, vector<64x1xf32>,
      %c1073741824_i32_25 = arith.constant 1073741824 : i32
      %48 = vector.broadcast %c1073741824_i32_25 : i32 to vector<64x1xi32>
      %c0_26 = arith.constant 0 : index
      %c0_27 = arith.constant 0 : index
      %49 = vector.load %arg5[%c0_26, %c0_27] : memref<64x1xi32, #tpu.memory_space<vmem>>, vector<64x1xi32>
      tpu.vector_store %arg5[%c0_26, %c0_27], %48 {strides = array<i32>} : memref<64x1xi32, #tpu.memory_space<vmem>>, vector<64x1xi32>,
      %c1073741824_i32_28 = arith.constant 1073741824 : i32
      %50 = vector.broadcast %c1073741824_i32_28 : i32 to vector<64x1xi32>
      %c0_29 = arith.constant 0 : index
      %c0_30 = arith.constant 0 : index
      %51 = vector.load %arg6[%c0_29, %c0_30] : memref<64x1xi32, #tpu.memory_space<vmem>>, vector<64x1xi32>
      tpu.vector_store %arg6[%c0_29, %c0_30], %50 {strides = array<i32>} : memref<64x1xi32, #tpu.memory_space<vmem>>, vector<64x1xi32>,
    } else {
    }
    %c0 = arith.constant 0 : index
    %c0_1 = arith.constant 0 : index
    %3 = vector.load %arg2[%c0, %c0_1] : memref<64x16xf32, #tpu.memory_space<vmem>>, vector<64x16xf32>
    %c16_i32 = arith.constant 16 : i32
    %4 = arith.muli %arg1, %c16_i32 : i32
    %5 = tpu.iota {dimensions = array<i32: 1>} : vector<64x16xi32>
    %6 = vector.broadcast %4 : i32 to vector<64x16xi32>
    %7 = arith.addi %6, %5 : vector<64x16xi32>
    %c16_i32_2 = arith.constant 16 : i32
    %8 = vector.broadcast %c16_i32_2 : i32 to vector<64x16xi32>
    %9 = arith.cmpi slt, %7, %8 : vector<64x16xi32>
    %10 = arith.cmpf one, %3, %3 : vector<64x16xf32>
    %11 = arith.andi %10, %9 : vector<64x16xi1>
    %c1073741824_i32 = arith.constant 1073741824 : i32
    %12 = vector.broadcast %c1073741824_i32 : i32 to vector<64x16xi32>
    %13 = arith.select %11, %7, %12 : vector<64x16xi1>, vector<64x16xi32>
    %cst_3 = arith.constant dense<2147483647> : vector<64xi32>
    %14 = vector.multi_reduction <minsi>, %13, %cst_3 [1] : vector<64x16xi32> to vector<64xi32>
    %15 = vector.shape_cast %14 : vector<64xi32> to vector<64x1xi32>
    %c0_4 = arith.constant 0 : index
    %c0_5 = arith.constant 0 : index
    %16 = vector.load %arg6[%c0_4, %c0_5] : memref<64x1xi32, #tpu.memory_space<vmem>>, vector<64x1xi32>
    %17 = arith.minsi %16, %15 : vector<64x1xi32>
    %c0_6 = arith.constant 0 : index
    %c0_7 = arith.constant 0 : index
    %18 = vector.load %arg6[%c0_6, %c0_7] : memref<64x1xi32, #tpu.memory_space<vmem>>, vector<64x1xi32>
    tpu.vector_store %arg6[%c0_6, %c0_7], %17 {strides = array<i32>} : memref<64x1xi32, #tpu.memory_space<vmem>>, vector<64x1xi32>,
    %cst_8 = arith.constant dense<true> : vector<64x16xi1>
    %19 = arith.xori %11, %cst_8 : vector<64x16xi1>
    %20 = arith.andi %9, %19 : vector<64x16xi1>
    %cst_9 = arith.constant 0xFF800000 : f32
    %21 = vector.broadcast %cst_9 : f32 to vector<64x16xf32>
    %22 = arith.select %20, %3, %21 : vector<64x16xi1>, vector<64x16xf32>
    %cst_10 = arith.constant dense<0xFF800000> : vector<64xf32>
    %23 = vector.multi_reduction <maximumf>, %22, %cst_10 [1] : vector<64x16xf32> to vector<64xf32>
    %24 = vector.shape_cast %23 : vector<64xf32> to vector<64x1xf32>
    %25 = vector.broadcast %24 : vector<64x1xf32> to vector<64x16xf32>
    %26 = arith.cmpf oeq, %22, %25 : vector<64x16xf32>
    %27 = arith.andi %20, %26 : vector<64x16xi1>
    %c1073741824_i32_11 = arith.constant 1073741824 : i32
    %28 = vector.broadcast %c1073741824_i32_11 : i32 to vector<64x16xi32>
    %29 = arith.select %27, %7, %28 : vector<64x16xi1>, vector<64x16xi32>
    %cst_12 = arith.constant dense<2147483647> : vector<64xi32>
    %30 = vector.multi_reduction <minsi>, %29, %cst_12 [1] : vector<64x16xi32> to vector<64xi32>
    %31 = vector.shape_cast %30 : vector<64xi32> to vector<64x1xi32>
    %c0_13 = arith.constant 0 : index
    %c0_14 = arith.constant 0 : index
    %32 = vector.load %arg4[%c0_13, %c0_14] : memref<64x1xf32, #tpu.memory_space<vmem>>, vector<64x1xf32>
    %c0_15 = arith.constant 0 : index
    %c0_16 = arith.constant 0 : index
    %33 = vector.load %arg5[%c0_15, %c0_16] : memref<64x1xi32, #tpu.memory_space<vmem>>, vector<64x1xi32>
    %34 = arith.cmpf ogt, %24, %32 : vector<64x1xf32>
    %35 = arith.cmpf oeq, %24, %32 : vector<64x1xf32>
    %36 = arith.cmpi slt, %31, %33 : vector<64x1xi32>
    %37 = arith.andi %35, %36 : vector<64x1xi1>
    %38 = arith.ori %34, %37 : vector<64x1xi1>
    %39 = arith.select %38, %24, %32 : vector<64x1xi1>, vector<64x1xf32>
    %c0_17 = arith.constant 0 : index
    %c0_18 = arith.constant 0 : index
    %40 = vector.load %arg4[%c0_17, %c0_18] : memref<64x1xf32, #tpu.memory_space<vmem>>, vector<64x1xf32>
    tpu.vector_store %arg4[%c0_17, %c0_18], %39 {strides = array<i32>} : memref<64x1xf32, #tpu.memory_space<vmem>>, vector<64x1xf32>,
    %41 = arith.select %38, %31, %33 : vector<64x1xi1>, vector<64x1xi32>
    %c0_19 = arith.constant 0 : index
    %c0_20 = arith.constant 0 : index
    %42 = vector.load %arg5[%c0_19, %c0_20] : memref<64x1xi32, #tpu.memory_space<vmem>>, vector<64x1xi32>
    tpu.vector_store %arg5[%c0_19, %c0_20], %41 {strides = array<i32>} : memref<64x1xi32, #tpu.memory_space<vmem>>, vector<64x1xi32>,
    %c0_i32_21 = arith.constant 0 : i32
    %43 = arith.cmpi eq, %arg1, %c0_i32_21 : i32
    %44 = arith.extui %43 : i1 to i32
    %c0_i32_22 = arith.constant 0 : i32
    %45 = arith.cmpi ne, %44, %c0_i32_22 : i32
    scf.if %45 {
      %c0_23 = arith.constant 0 : index
      %c0_24 = arith.constant 0 : index
      %46 = vector.load %arg5[%c0_23, %c0_24] : memref<64x1xi32, #tpu.memory_space<vmem>>, vector<64x1xi32>
      %c0_25 = arith.constant 0 : index
      %c0_26 = arith.constant 0 : index
      %47 = vector.load %arg6[%c0_25, %c0_26] : memref<64x1xi32, #tpu.memory_space<vmem>>, vector<64x1xi32>
      %c1073741824_i32_27 = arith.constant 1073741824 : i32
      %48 = vector.broadcast %c1073741824_i32_27 : i32 to vector<64x1xi32>
      %49 = arith.cmpi slt, %47, %48 : vector<64x1xi32>
      %c0_28 = arith.constant 0 : index
      %c0_29 = arith.constant 0 : index
      %50 = vector.load %arg6[%c0_28, %c0_29] : memref<64x1xi32, #tpu.memory_space<vmem>>, vector<64x1xi32>
      %51 = arith.select %49, %50, %46 : vector<64x1xi1>, vector<64x1xi32>
      %c0_30 = arith.constant 0 : index
      %c0_31 = arith.constant 0 : index
      %52 = vector.load %arg3[%c0_30, %c0_31] : memref<64x1xi32, #tpu.memory_space<vmem>>, vector<64x1xi32>
      tpu.vector_store %arg3[%c0_30, %c0_31], %51 {strides = array<i32>} : memref<64x1xi32, #tpu.memory_space<vmem>>, vector<64x1xi32>,
    } else {
    }
    return
  }
  func.func @transform_0(%arg0: i32, %arg1: i32) -> (i32, i32) {
    %c0_i32 = arith.constant 0 : i32
    return %arg0, %arg1 : i32, i32
  }
  func.func @transform_1(%arg0: i32, %arg1: i32) -> (i32, i32) {
    %c0_i32 = arith.constant 0 : i32
    %c0_i32_0 = arith.constant 0 : i32
    return %arg0, %c0_i32 : i32, i32
  }
}

</mosaic_0001>

<bundles_post_ra>
// kernel: tpu_custom_call.1
= control target key start
LH: loop header
LB: loop body
LE: loop exit
PB: predicated region body
PF: predicated region fallthrough
CT: control target
= control target key end

     0   :  { %s830_s6 = smov 0   ;;  %s832_s7 = smov 0   ;;  %s1478_s0 = inlined_call_operand.vmem [shape: f32[128,16], index: 0, kind: input, shape index: {}]   ;;  %s1479_s1 = inlined_call_operand.vmem [shape: s32[128,1], index: 1, kind: output, shape index: {}]  }
   0x1   :  { %s834_s8 = smov 0  }
   0x2 LB: > { %s23_s9 = sadd.s32 1, %s811_s7  ;;  %p759_p0 = scmp.ge.s32.totalorder %s815_s8, 1  ;;  %s815_s8 = sphi %s834_s8, %s11_s8   ;;  %s811_s7 = sphi %s832_s7, %s1593_s7   ;;  %s807_s6 = sphi %s830_s6, %s1592_s6  }
   0x3   : > { %p25_p1 = scmp.ge.s32.totalorder %s23_s9, 2  ;;  %p105_p2 = scmp.lt.s32.totalorder %s815_s8, 3 }
   0x5   : > { %s1595_s9 = smov (%p25_p1, %s23_s9), 0  ;;  %p106_p3 = pnand %p759_p0, %p105_p2 }
   0x6   : > { %s760_s10 = sshll.u32 (!%p106_p3), %s807_s6, 3  ;;  %v181_v0 = vlaneseq (!%p106_p3)  ;;  %vm1480_vm0 = vcmask (!%p106_p3), 7168   ;;  %v817_v2 = vmov (!%p106_p3), -inf   ;;  %vm1483_vm5 = vcmask (!%p106_p3), 130048  }
   0x7   : > { %109 = sbr.rel (%p106_p3) target bundleno = 513 (0x201), region = 24  ;;  %p129_p4 = scmp.lt.s32.totalorder (!%p106_p3), %s760_s10, 15  ;;  %148 = vst.msk [vmem:[#allocation2] sm:$0xff] (!%p106_p3), %vm1480_vm0, %v817_v2  ;;  %149 = vst.msk [vmem:[#allocation2 + $0x8] sm:$0xff] (!%p106_p3), %vm1480_vm0, %v817_v2  ;;  %vm1481_vm6 = vmmov (!%p106_p3), 1   ;;  %v1504_v28 = vmov (!%p106_p3), 0 }
   0x8   : > { %v848_v1 = vand.u32 (!%p106_p3), 127, %v181_v0  ;;  %150 = vst.msk [vmem:[#allocation2 + $0x10] sm:$0xff] (!%p106_p3), %vm1480_vm0, %v817_v2  ;;  %151 = vst.msk [vmem:[#allocation2 + $0x18] sm:$0xff] (!%p106_p3), %vm1480_vm0, %v817_v2  ;;  %v1509_v35 = vmov (!%p106_p3), 0 }
   0x9   : > { %152 = vst.msk [vmem:[#allocation2 + $0x20] sm:$0xff] (!%p106_p3), %vm1480_vm0, %v817_v2  ;;  %153 = vst.msk [vmem:[#allocation2 + $0x28] sm:$0xff] (!%p106_p3), %vm1480_vm0, %v817_v2 }
   0xa   : > { %154 = vst.msk [vmem:[#allocation2 + $0x30] sm:$0xff] (!%p106_p3), %vm1480_vm0, %v817_v2  ;;  %155 = vst.msk [vmem:[#allocation2 + $0x38] sm:$0xff] (!%p106_p3), %vm1480_vm0, %v817_v2  ;;  %vm185_vm1 = vcmp.lt.s32.totalorder (!%p106_p3), %v848_v1, 16 }
   0xe   : > { %s1597_s10 = smov (!%p129_p4, %s760_s10), 15 }
   0xf   : > { %s761_s11 = sshll.u32 %s1597_s10, 3 }
  0x10   : > { %s866_s14 = scalar_lea.vmem %s1478_s0, %s761_s11  ;;  %s1377_s17 = scalar_lea.vmem %s1479_s1, %s761_s11 }
  0x11   : > { %v172_v3 = vld [vmem:[%s866_s14] sm:$0xff]  ;;  %v174_v4 = vld [vmem:[%s866_s14 + $0x10] sm:$0xff]  ;;  %v173_v6 = vld [vmem:[%s866_s14 + $0x8] sm:$0xff] }
  0x12   : > { %vm186_vm2 = vcmp.ne.f32.partialorder %v172_v3, %v172_v3  ;;  %vm188_vm4 = vcmp.ne.f32.partialorder %v174_v4, %v174_v4  ;;  %vm187_vm10 = vcmp.ne.f32.partialorder %v173_v6, %v173_v6  ;;  %v175_v10 = vld [vmem:[%s866_s14 + $0x18] sm:$0xff]  ;;  %v176_v15 = vld [vmem:[%s866_s14 + $0x20] sm:$0xff]  ;;  %v177_v20 = vld [vmem:[%s866_s14 + $0x28] sm:$0xff] }
  0x13   : > { %vm873_vm3 = vmand %vm186_vm2, %vm185_vm1  ;;  %vm189_vm14 = vcmp.ne.f32.partialorder %v175_v10, %v175_v10  ;;  %v178_v25 = vld [vmem:[%s866_s14 + $0x30] sm:$0xff]  ;;  %v179_v31 = vld [vmem:[%s866_s14 + $0x38] sm:$0xff] }
  0x14   : > { %vm364_vm7 = vmxor %vm873_vm3, %vm1481_vm6  ;;  %v202_v27 = vsel %vm873_vm3, %v848_v1, 1073741824  ;;  %vm1508_vm3 = vmmov 1  }
  0x15   : > { %vm883_vm8 = vmand %vm185_vm1, %vm364_vm7  ;;  %vm190_vm7 = vcmp.ne.f32.partialorder %v176_v15, %v176_v15  ;;  %v995_v33 = vsel %vm1483_vm5, %v202_v27, 2147483647 }
  0x16   : > { %v889_v8 = vsel %vm883_vm8, %v172_v3, -inf  ;;  %vm893_vm9 = vmand %vm188_vm4, %vm185_vm1  ;;  %v213_v40 = vshra.s32 %v995_v33, 16 }
  0x17   : > { %v388_v11 = vsel %vm1483_vm5, %v889_v8, -inf  ;;  %vm366_vm11 = vmxor %vm893_vm9, %vm1481_vm6  ;;  %v204_v36 = vsel %vm893_vm9, %v848_v1, 1073741824 }
  0x18   : > { %389 = vmax.xlane.f32.xlu0 %v388_v11  ;;  %vm905_vm12 = vmand %vm185_vm1, %vm366_vm11  ;;  %v1065_v51 = vcvt.s32.f32 %v213_v40 }
  0x19   : > { %v911_v13 = vsel %vm905_vm12, %v174_v4, -inf  ;;  %vm915_vm13 = vmand %vm187_vm10, %vm185_vm1 }
  0x1a   : > { %v394_v16 = vsel %vm1483_vm5, %v911_v13, -inf  ;;  %vm365_vm15 = vmxor %vm915_vm13, %vm1481_vm6  ;;  %v203_v34 = vsel %vm915_vm13, %v848_v1, 1073741824  ;;  %vm193_vm13 = vcmp.ne.f32.partialorder %v179_v31, %v179_v31 }
  0x1b   : > { %395 = vmax.xlane.f32.xlu1 %v394_v16  ;;  %vm927_vm2 = vmand %vm185_vm1, %vm365_vm15  ;;  %vm191_vm15 = vcmp.ne.f32.partialorder %v177_v20, %v177_v20 }
  0x1c   : > { %v933_v18 = vsel %vm927_vm2, %v173_v6, -inf  ;;  %vm937_vm4 = vmand %vm189_vm14, %vm185_vm1 }
  0x1d   : > { %v391_v21 = vsel %vm1483_vm5, %v933_v18, -inf  ;;  %vm367_vm10 = vmxor %vm937_vm4, %vm1481_vm6  ;;  %v205_v44 = vsel %vm937_vm4, %v848_v1, 1073741824 }
  0x1e   : > { %392 = vmax.xlane.f32.xlu0 %v391_v21  ;;  %vm949_vm11 = vmand %vm185_vm1, %vm367_vm10 }
  0x1f   : > { %v955_v23 = vsel %vm949_vm11, %v175_v10, -inf  ;;  %vm959_vm14 = vmand %vm190_vm7, %vm185_vm1 }
  0x20   : > { %v397_v26 = vsel %vm1483_vm5, %v955_v23, -inf  ;;  %vm368_vm10 = vmxor %vm959_vm14, %vm1481_vm6  ;;  %vm192_vm6 = vcmp.ne.f32.partialorder %v178_v25, %v178_v25  ;;  %v206_v47 = vsel %vm959_vm14, %v848_v1, 1073741824 }
  0x21   : > { %398 = vmax.xlane.f32.xlu1 %v397_v26  ;;  %vm974_vm7 = vmand %vm185_vm1, %vm368_vm10 }
  0x22   : > { %v1505_v28 = vsel %vm974_vm7, 4294967295, %v1504_v28  ;;  %v980_v29 = vsel %vm974_vm7, %v176_v15, -inf  ;;  %vm984_vm0 = vmand %vm191_vm15, %vm185_vm1 }
  0x23   : > { %v400_v32 = vsel %vm1483_vm5, %v980_v29, -inf  ;;  %vm369_vm10 = vmxor %vm984_vm0, %vm1508_vm3  ;;  %v207_v56 = vsel %vm984_vm0, %v848_v1, 1073741824 }
  0x24   : > { %401 = vmax.xlane.f32.xlu0 %v400_v32  ;;  %vm1002_vm15 = vmand %vm185_vm1, %vm369_vm10  ;;  %vm1513_vm10 = vcmask 130048  }
  0x25   : > { %v1510_v35 = vsel %vm1002_vm15, 4294967295, %v1509_v35  ;;  %v1011_v37 = vsel %vm1002_vm15, %v177_v20, -inf  ;;  %vm1015_vm5 = vmand %vm192_vm6, %vm185_vm1 }
  0x26   : > { %v403_v39 = vsel %vm1513_vm10, %v1011_v37, -inf  ;;  %vm370_vm7 = vmxor %vm1015_vm5, %vm1508_vm3 }
  0x27   : > { %vm1514_vm9 = vmmov %vm1513_vm10  ;;  %404 = vmax.xlane.f32.xlu1 %v403_v39 }
  0x28   : > { %v1026_v41 = vsel %vm1514_vm9, %v203_v34, 2147483647  ;;  %vm1030_vm6 = vmand %vm185_vm1, %vm370_vm7 }
  0x29   : > { %vm1517_vm15 = vmmov %vm1514_vm9  ;;  %v1042_v45 = vsel %vm1030_vm6, %v178_v25, -inf  ;;  %v228_v49 = vshra.s32 %v1026_v41, 16 }
  0x2a   : > { %v1035_v43 = vsel %vm1517_vm15, %v204_v36, 2147483647  ;;  %vm1046_vm10 = vmand %vm193_vm13, %vm185_vm1 }
  0x2b   : > { %vm1520_vm7 = vmmov %vm1514_vm9  ;;  %v243_v52 = vshra.s32 %v1035_v43, 16  ;;  %v1083_v58 = vcvt.s32.f32 %v228_v49  ;;  %v209_v36 = vsel %vm1046_vm10, %v848_v1, 1073741824  ;;  %v212_v49 = vand.u32 65535, %v995_v33 }
  0x2c   : > { %v406_v48 = vsel %vm1520_vm7, %v1042_v45, -inf  ;;  %vm371_vm4 = vmxor %vm1046_vm10, %vm1508_vm3 }
  0x2d   : > { %407 = vmax.xlane.f32.xlu0 %v406_v48  ;;  %vm1061_vm15 = vmand %vm185_vm1, %vm371_vm4  ;;  %v1087_v60 = vcvt.s32.f32 %v243_v52 }
  0x2e   : > { %vm1523_vm14 = vmmov %vm1520_vm7  ;;  %v1073_v54 = vsel %vm1061_vm15, %v179_v31, -inf }
  0x2f   : > { %v1069_v53 = vsel %vm1523_vm14, %v205_v44, 2147483647  ;;  %vm1524_vm3 = vmmov %vm1520_vm7 }
  0x30   : > { %v1076_v55 = vsel %vm1524_vm3, %v206_v47, 2147483647  ;;  %vm1525_vm1 = vmmov %vm1524_vm3  ;;  %v258_v59 = vshra.s32 %v1069_v53, 16 }
  0x31   : > { %v409_v57 = vsel %vm1525_vm1, %v1073_v54, -inf  ;;  %216 = vmin.xlane.f32.xlu0 %v1065_v51  ;;  %v273_v61 = vshra.s32 %v1076_v55, 16  ;;  %vm1526_vm13 = vmmov %vm1525_vm1 }
  0x32   : > { %410 = vmax.xlane.f32.xlu1 %v409_v57  ;;  %v1091_v62 = vsel %vm1526_vm13, %v207_v56, 2147483647  ;;  %v1094_v63 = vcvt.s32.f32 %v258_v59  ;;  %vm1527_vm4 = vmmov %vm1525_vm1 }
  0x33   : > { %v288_v0 = vshra.s32 %v1091_v62, 16  ;;  %v1098_v2 = vcvt.s32.f32 %v273_v61  ;;  %vm1528_vm13 = vmmov %vm1525_vm1  ;;  %v214_v61 = vcvt.s32.f32 %v212_v49 }
  0x35   : > { %246 = vmin.xlane.f32.xlu0 %v1087_v60  ;;  %v1101_v3 = vcvt.s32.f32 %v288_v0 }
  0x36   : > { %231 = vmin.xlane.f32.xlu1 %v1083_v58 }
  0x39   : > { %276 = vmin.xlane.f32.xlu0 %v1098_v2 }
  0x3a   : > { %261 = vmin.xlane.f32.xlu1 %v1094_v63 }
  0x3e   : > { %291 = vmin.xlane.f32.xlu1 %v1101_v3 }
  0xa5   : > { %v1105_v4 = vpop.xlane.xlu0 %389 }
  0xa6   : > { %vm412_vm0 = vcmp.eq.f32.partialorder %v889_v8, %v1105_v4 }
  0xa7   : > { %vm420_vm9 = vmand %vm883_vm8, %vm412_vm0 }
  0xa8   : > { %v1111_v5 = vpop.xlane.xlu1 %395  ;;  %v428_v6 = vsel %vm420_vm9, %v848_v1, 1073741824  ;;  %vm1529_vm9 = vmmov %vm1525_vm1 }
  0xa9   : > { %vm414_vm7 = vcmp.eq.f32.partialorder %v911_v13, %v1111_v5  ;;  %v1117_v9 = vsel %vm1527_vm4, %v428_v6, 2147483647  ;;  %v242_v6 = vand.u32 65535, %v1035_v43  ;;  %v272_v43 = vand.u32 65535, %v1076_v55 }
  0xaa   : > { %v438_v10 = vshra.s32 %v1117_v9, 16  ;;  %vm422_vm14 = vmand %vm905_vm12, %vm414_vm7  ;;  %vm1530_vm7 = vnez %v1505_v28  ;;  %v208_v28 = vsel %vm1015_vm5, %v848_v1, 1073741824 }
  0xab   : > { %v1122_v11 = vpop.xlane.xlu0 %392  ;;  %v430_v7 = vsel %vm422_vm14, %v848_v1, 1073741824  ;;  %vm1531_vm14 = vmmov %vm1525_vm1 }
  0xac   : > { %vm413_vm8 = vcmp.eq.f32.partialorder %v933_v18, %v1122_v11  ;;  %v1127_v8 = vcvt.s32.f32 %v438_v10  ;;  %v1132_v13 = vsel %vm1525_vm1, %v430_v7, 2147483647 }
  0xad   : > { %vm421_vm3 = vmand %vm927_vm2, %vm413_vm8  ;;  %v468_v15 = vshra.s32 %v1132_v13, 16  ;;  %vm1532_vm8 = vnez %v1510_v35 }
  0xae   : > { %v1134_v14 = vpop.xlane.xlu1 %398  ;;  %441 = vmin.xlane.f32.xlu0 %v1127_v8  ;;  %v429_v12 = vsel %vm421_vm3, %v848_v1, 1073741824 }
  0xaf   : > { %vm415_vm12 = vcmp.eq.f32.partialorder %v955_v23, %v1134_v14  ;;  %v1142_v16 = vsel %vm1528_vm13, %v429_v12, 2147483647  ;;  %v1145_v18 = vcvt.s32.f32 %v468_v15 }
  0xb0   : > { %v453_v17 = vshra.s32 %v1142_v16, 16  ;;  %vm423_vm2 = vmand %vm949_vm11, %vm415_vm12 }
  0xb1   : > { %v1149_v19 = vpop.xlane.xlu0 %401  ;;  %v431_v20 = vsel %vm423_vm2, %v848_v1, 1073741824  ;;  %vm1533_vm12 = vmmov %vm1529_vm9 }
  0xb2   : > { %vm416_vm0 = vcmp.eq.f32.partialorder %v980_v29, %v1149_v19  ;;  %v1154_v21 = vcvt.s32.f32 %v453_v17  ;;  %471 = vmin.xlane.f32.xlu0 %v1145_v18  ;;  %v1158_v23 = vsel %vm1529_vm9, %v431_v20, 2147483647  ;;  %vm1534_vm2 = vmmov %vm1529_vm9  ;;  %v244_v17 = vcvt.s32.f32 %v242_v6 }
  0xb3   : > { %vm424_vm4 = vmand %vm1530_vm7, %vm416_vm0  ;;  %v483_v22 = vshra.s32 %v1158_v23, 16  ;;  %v1194_v35 = vsel %vm1534_vm2, %v208_v28, 2147483647 }
  0xb4   : > { %v1162_v24 = vpop.xlane.xlu1 %404  ;;  %456 = vmin.xlane.f32.xlu1 %v1154_v21  ;;  %v432_v25 = vsel %vm424_vm4, %v848_v1, 1073741824  ;;  %vm1535_vm0 = vmmov %vm1534_vm2  ;;  %v303_v46 = vshra.s32 %v1194_v35, 16 }
  0xb5   : > { %vm417_vm11 = vcmp.eq.f32.partialorder %v1011_v37, %v1162_v24  ;;  %v1170_v26 = vsel %vm1531_vm14, %v432_v25, 2147483647  ;;  %v1172_v27 = vcvt.s32.f32 %v483_v22  ;;  %vm1536_vm10 = vmmov %vm1535_vm0  ;;  %v287_v25 = vand.u32 65535, %v1091_v62 }
  0xb6   : > { %v498_v29 = vshra.s32 %v1170_v26, 16  ;;  %vm425_vm3 = vmand %vm1532_vm8, %vm417_vm11  ;;  %v1218_v47 = vsel %vm1536_vm10, %v209_v36, 2147483647  ;;  %v1233_v59 = vcvt.s32.f32 %v303_v46  ;;  %v467_v36 = vand.u32 65535, %v1132_v13 }
  0xb7   : > { %v433_v31 = vsel %vm425_vm3, %v848_v1, 1073741824  ;;  %vm1537_vm9 = vmmov %vm1535_vm0  ;;  %v318_v57 = vshra.s32 %v1218_v47, 16  ;;  %vm1538_vm3 = vcmask 7168   ;;  %v497_v13 = vand.u32 65535, %v1170_v26 }
  0xb8   : > { %486 = vmin.xlane.f32.xlu1 %v1172_v27  ;;  %v1186_v32 = vcvt.s32.f32 %v498_v29  ;;  %v1189_v34 = vsel %vm1533_vm12, %v433_v31, 2147483647  ;;  %v289_v29 = vcvt.s32.f32 %v287_v25  ;;  %v819_v31 = vmov 1073741824  }
  0xb9   : > { %v513_v38 = vshra.s32 %v1189_v34, 16  ;;  %v1244_v10 = vcvt.s32.f32 %v318_v57  ;;  %164 = vst.msk [vmem:[#allocation4] sm:$0xff] %vm1538_vm3, %v819_v31  ;;  %v469_v46 = vcvt.s32.f32 %v467_v36 }
  0xba   : > { %v1180_v30 = vpop.xlane.xlu0 %407  ;;  %501 = vmin.xlane.f32.xlu0 %v1186_v32 }
  0xbb   : > { %vm418_vm1 = vcmp.eq.f32.partialorder %v1042_v45, %v1180_v30  ;;  %v1211_v44 = vcvt.s32.f32 %v513_v38 }
  0xbc   : > { %vm426_vm13 = vmand %vm1030_vm6, %vm418_vm1 }
  0xbd   : > { %v434_v39 = vsel %vm426_vm13, %v848_v1, 1073741824  ;;  %516 = vmin.xlane.f32.xlu1 %v1211_v44  ;;  %vm1539_vm1 = vmmov %vm1538_vm3 }
  0xbe   : > { %v1207_v40 = vsel %vm1535_vm0, %v434_v39, 2147483647  ;;  %v1209_v42 = vpop.xlane.xlu0 %216  ;;  %156 = vst.msk [vmem:[#allocation3] sm:$0xff] %vm1539_vm1, %v819_v31  ;;  %vm1540_vm12 = vmmov %vm1539_vm1  ;;  %v452_v39 = vand.u32 65535, %v1142_v16 }
  0xbf   : > { %v1199_v37 = vpop.xlane.xlu1 %410  ;;  %v528_v45 = vshra.s32 %v1207_v40, 16  ;;  %157 = vst.msk [vmem:[#allocation3 + $0x8] sm:$0xff] %vm1540_vm12, %v819_v31  ;;  %vm1541_vm13 = vmmov %vm1539_vm1  ;;  %v527_v26 = vand.u32 65535, %v1207_v40 }
  0xc0   : > { %vm419_vm5 = vcmp.eq.f32.partialorder %v1073_v54, %v1199_v37  ;;  %158 = vst.msk [vmem:[#allocation3 + $0x10] sm:$0xff] %vm1541_vm13, %v819_v31  ;;  %vm1542_vm2 = vmmov %vm1539_vm1 }
  0xc1   : > { %vm427_vm6 = vmand %vm1061_vm15, %vm419_vm5  ;;  %v1223_v52 = vcvt.s32.f32 %v528_v45  ;;  %vm218_vm15 = vcmp.eq.f32.partialorder %v1065_v51, %v1209_v42  ;;  %159 = vst.msk [vmem:[#allocation3 + $0x18] sm:$0xff] %vm1542_vm2, %v819_v31 }
  0xc2   : > { %v435_v48 = vsel %vm427_vm6, %v848_v1, 1073741824  ;;  %v227_v1 = vand.u32 65535, %v1026_v41  ;;  %v1238_v0 = vpop.xlane.xlu0 %246  ;;  %v257_v41 = vand.u32 65535, %v1069_v53  ;;  %v219_v15 = vsel %vm218_vm15, %v214_v61, inf  ;;  %vm1543_vm5 = vmmov %vm1539_vm1 }
  0xc3   : > { %v1226_v54 = vsel %vm1537_vm9, %v435_v48, 2147483647  ;;  %v1228_v56 = vpop.xlane.xlu1 %231  ;;  %531 = vmin.xlane.f32.xlu0 %v1223_v52  ;;  %vm248_vm4 = vcmp.eq.f32.partialorder %v1087_v60, %v1238_v0  ;;  %160 = vst.msk [vmem:[#allocation3 + $0x20] sm:$0xff] %vm1543_vm5, %v819_v31  ;;  %vm1544_vm0 = vmmov %vm1539_vm1  ;;  %v499_v61 = vcvt.s32.f32 %v497_v13 }
  0xc4   : > { %v543_v50 = vshra.s32 %v1226_v54, 16  ;;  %v229_v7 = vcvt.s32.f32 %v227_v1  ;;  %vm233_vm7 = vcmp.eq.f32.partialorder %v1083_v58, %v1228_v56  ;;  %v259_v22 = vcvt.s32.f32 %v257_v41  ;;  %161 = vst.msk [vmem:[#allocation3 + $0x28] sm:$0xff] %vm1544_vm0, %v819_v31  ;;  %vm1545_vm6 = vmmov %vm1544_vm0 }
  0xc5   : > { %v249_v53 = vsel %vm248_vm4, %v244_v17, inf  ;;  %v274_v58 = vcvt.s32.f32 %v272_v43  ;;  %162 = vst.msk [vmem:[#allocation3 + $0x30] sm:$0xff] %vm1545_vm6, %v819_v31  ;;  %vm1546_vm10 = vmmov %vm1544_vm0  ;;  %v302_v41 = vand.u32 65535, %v1194_v35  ;;  %v529_v17 = vcvt.s32.f32 %v527_v26 }
  0xc6   : > { %v1236_v33 = vcvt.s32.f32 %v543_v50  ;;  %v1256_v51 = vpop.xlane.xlu0 %276  ;;  %v234_v20 = vsel %vm233_vm7, %v229_v7, inf  ;;  %163 = vst.msk [vmem:[#allocation3 + $0x38] sm:$0xff] %vm1546_vm10, %v819_v31  ;;  %vm1547_vm9 = vmmov %vm1544_vm0  ;;  %v482_v50 = vand.u32 65535, %v1158_v23  ;;  %v512_v23 = vand.u32 65535, %v1189_v34 }
  0xc7   : > { %306 = vmin.xlane.f32.xlu0 %v1233_v59  ;;  %v1247_v12 = vpop.xlane.xlu1 %261  ;;  %vm278_vm14 = vcmp.eq.f32.partialorder %v1098_v2, %v1256_v51  ;;  %165 = vst.msk [vmem:[#allocation4 + $0x8] sm:$0xff] %vm1547_vm9, %v819_v31  ;;  %vm1548_vm15 = vmmov %vm1544_vm0  ;;  %v304_v43 = vcvt.s32.f32 %v302_v41 }
  0xc8   : > { %546 = vmin.xlane.f32.xlu1 %v1236_v33  ;;  %vm263_vm11 = vcmp.eq.f32.partialorder %v1094_v63, %v1247_v12  ;;  %v279_v28 = vsel %vm278_vm14, %v274_v58, inf  ;;  %166 = vst.msk [vmem:[#allocation4 + $0x10] sm:$0xff] %vm1548_vm15, %v819_v31  ;;  %vm1549_vm7 = vmmov %vm1544_vm0  ;;  %v437_v63 = vand.u32 65535, %v1117_v9  ;;  %v454_v9 = vcvt.s32.f32 %v452_v39 }
  0xc9   : > { %v264_v60 = vsel %vm263_vm11, %v259_v22, inf  ;;  %167 = vst.msk [vmem:[#allocation4 + $0x18] sm:$0xff] %vm1549_vm7, %v819_v31  ;;  %vm1550_vm4 = vmmov %vm1544_vm0  ;;  %v484_v57 = vcvt.s32.f32 %v482_v50  ;;  %v514_v7 = vcvt.s32.f32 %v512_v23 }
  0xca   : > { %168 = vst.msk [vmem:[#allocation4 + $0x20] sm:$0xff] %vm1550_vm4, %v819_v31  ;;  %vm1551_vm11 = vmmov %vm1544_vm0 }
  0xcb   : > { %220 = vmin.xlane.f32.xlu0 %v219_v15  ;;  %v1263_v55 = vpop.xlane.xlu1 %291  ;;  %169 = vst.msk [vmem:[#allocation4 + $0x28] sm:$0xff] %vm1551_vm11, %v819_v31  ;;  %vm1552_vm14 = vmmov %vm1544_vm0 }
  0xcc   : > { %321 = vmin.xlane.f32.xlu1 %v1244_v10  ;;  %vm293_vm8 = vcmp.eq.f32.partialorder %v1101_v3, %v1263_v55  ;;  %170 = vst.msk [vmem:[#allocation4 + $0x30] sm:$0xff] %vm1552_vm14, %v819_v31  ;;  %v439_v3 = vcvt.s32.f32 %v437_v63  ;;  %v268_v63 = vcvt.f32.s32 %v1247_v12  ;;  %vm1554_vm7 = vmmov %vm1550_vm4  ;;  %v298_v13 = vcvt.f32.s32 %v1263_v55 }
  0xcd   : > { %v294_v62 = vsel %vm293_vm8, %v289_v29, inf  ;;  %vm1553_vm8 = vmmov %vm1544_vm0 }
  0xce   : > { %171 = vst.msk [vmem:[#allocation4 + $0x38] sm:$0xff] %vm1553_vm8, %v819_v31  ;;  %v332_v39 = vld [vmem:[#allocation4 + $0x8] sm:$0xff]  ;;  %vm1555_vm14 = vmmov %vm1554_vm7 }
  0xcf   : > { %250 = vmin.xlane.f32.xlu0 %v249_v53  ;;  %v238_v53 = vcvt.f32.s32 %v1228_v56  ;;  %v283_v56 = vcvt.f32.s32 %v1256_v51  ;;  %vm1556_vm8 = vmmov %vm1554_vm7 }
  0xd0   : > { %235 = vmin.xlane.f32.xlu1 %v234_v20  ;;  %v334_v51 = vld [vmem:[#allocation4 + $0x18] sm:$0xff] }
  0xd1   : > { %v239_v31 = vshll.u32 %v238_v53, 16 }
  0xd3   : > { %280 = vmin.xlane.f32.xlu0 %v279_v28  ;;  %v331_v28 = vld [vmem:[#allocation4] sm:$0xff] }
  0xd4   : > { %265 = vmin.xlane.f32.xlu1 %v264_v60 }
  0xd8   : > { %295 = vmin.xlane.f32.xlu1 %v294_v62 }
 0x13b   : > { %v1284_v2 = vpop.xlane.xlu0 %441 }
 0x13c   : > { %vm443_vm3 = vcmp.eq.f32.partialorder %v1127_v8, %v1284_v2 }
 0x13d   : > { %v444_v38 = vsel %vm443_vm3, %v439_v3, inf }
 0x13e   : > { %445 = vmin.xlane.f32.xlu0 %v444_v38 }
 0x13f   : > { %v1290_v45 = vpop.xlane.xlu0 %471 }
 0x140   : > { %vm473_vm1 = vcmp.eq.f32.partialorder %v1145_v18, %v1290_v45 }
 0x141   : > { %v1294_v48 = vpop.xlane.xlu1 %456  ;;  %v474_v49 = vsel %vm473_vm1, %v469_v46, inf }
 0x142   : > { %vm458_vm12 = vcmp.eq.f32.partialorder %v1154_v21, %v1294_v48  ;;  %475 = vmin.xlane.f32.xlu0 %v474_v49 }
 0x143   : > { %v459_v8 = vsel %vm458_vm12, %v454_v9, inf  ;;  %vm1557_vm12 = vmmov %vm1554_vm7 }
 0x144   : > { %460 = vmin.xlane.f32.xlu1 %v459_v8  ;;  %v269_v8 = vshll.u32 %v268_v63, 16 }
 0x145   : > { %v1300_v16 = vpop.xlane.xlu1 %486 }
 0x146   : > { %vm488_vm13 = vcmp.eq.f32.partialorder %v1172_v27, %v1300_v16  ;;  %v542_v27 = vand.u32 65535, %v1226_v54 }
 0x147   : > { %v1304_v18 = vpop.xlane.xlu0 %501  ;;  %v489_v1 = vsel %vm488_vm13, %v484_v57, inf  ;;  %vm1558_vm13 = vmmov %vm1554_vm7 }
 0x148   : > { %490 = vmin.xlane.f32.xlu1 %v489_v1  ;;  %vm503_vm2 = vcmp.eq.f32.partialorder %v1186_v32, %v1304_v18  ;;  %v317_v32 = vand.u32 65535, %v1218_v47  ;;  %v544_v35 = vcvt.s32.f32 %v542_v27  ;;  %v284_v1 = vshll.u32 %v283_v56, 16 }
 0x149   : > { %v504_v21 = vsel %vm503_vm2, %v499_v61, inf }
 0x14a   : > { %505 = vmin.xlane.f32.xlu0 %v504_v21  ;;  %v1310_v6 = vpop.xlane.xlu1 %516 }
 0x14b   : > { %vm518_vm5 = vcmp.eq.f32.partialorder %v1211_v44, %v1310_v6  ;;  %v223_v44 = vcvt.f32.s32 %v1209_v42 }
 0x14c   : > { %v519_v34 = vsel %vm518_vm5, %v514_v7, inf  ;;  %v335_v7 = vld [vmem:[#allocation4 + $0x20] sm:$0xff]  ;;  %vm1559_vm5 = vmmov %vm1554_vm7 }
 0x14d   : > { %520 = vmin.xlane.f32.xlu1 %v519_v34  ;;  %v224_v60 = vshll.u32 %v223_v44, 16  ;;  %v299_v34 = vshll.u32 %v298_v13, 16  ;;  %v448_v44 = vcvt.f32.s32 %v1284_v2 }
 0x150   : > { %v1316_v15 = vpop.xlane.xlu0 %531 }
 0x151   : > { %vm533_vm0 = vcmp.eq.f32.partialorder %v1223_v52, %v1316_v15  ;;  %v319_v52 = vcvt.s32.f32 %v317_v32  ;;  %v336_v32 = vld [vmem:[#allocation4 + $0x28] sm:$0xff] }
 0x152   : > { %v534_v40 = vsel %vm533_vm0, %v529_v17, inf }
 0x153   : > { %535 = vmin.xlane.f32.xlu0 %v534_v40 }
 0x154   : > { %v1323_v22 = vpop.xlane.xlu0 %306 }
 0x155   : > { %v1321_v20 = vpop.xlane.xlu1 %546  ;;  %vm308_vm10 = vcmp.eq.f32.partialorder %v1233_v59, %v1323_v22 }
 0x156   : > { %vm548_vm6 = vcmp.eq.f32.partialorder %v1236_v33, %v1321_v20  ;;  %v309_v47 = vsel %vm308_vm10, %v304_v43, inf  ;;  %v253_v33 = vcvt.f32.s32 %v1238_v0  ;;  %v333_v0 = vld [vmem:[#allocation4 + $0x10] sm:$0xff] }
 0x157   : > { %v549_v54 = vsel %vm548_vm6, %v544_v35, inf  ;;  %310 = vmin.xlane.f32.xlu0 %v309_v47  ;;  %v478_v47 = vcvt.f32.s32 %v1290_v45  ;;  %v493_v45 = vcvt.f32.s32 %v1300_v16 }
 0x158   : > { %550 = vmin.xlane.f32.xlu1 %v549_v54  ;;  %v221_v58 = vpop.xlane.xlu0 %220  ;;  %v254_v38 = vshll.u32 %v253_v33, 16  ;;  %v463_v33 = vcvt.f32.s32 %v1294_v48  ;;  %v557_v48 = vld [vmem:[#allocation2 + $0x8] sm:$0xff] }
 0x159   : > { %v1330_v25 = vpop.xlane.xlu1 %321  ;;  %v222_v42 = vcvt.f32.s32 %v221_v58  ;;  %v556_v58 = vld [vmem:[#allocation2] sm:$0xff] }
 0x15a   : > { %vm323_vm9 = vcmp.eq.f32.partialorder %v1244_v10, %v1330_v25  ;;  %vm580_vm0 = vcmp.eq.f32.partialorder %v1105_v4, %v556_v58  ;;  %vm572_vm10 = vcmp.gt.f32.partialorder %v1105_v4, %v556_v58  ;;  %v464_v63 = vshll.u32 %v463_v33, 16 }
 0x15b   : > { %v324_v29 = vsel %vm323_vm9, %v319_v52, inf  ;;  %v225_v59 = vadd.s32 %v224_v60, %v222_v42  ;;  %v449_v52 = vshll.u32 %v448_v44, 16  ;;  %v564_v60 = vld [vmem:[#allocation3] sm:$0xff]  ;;  %v569_v44 = vld [vmem:[#allocation3 + $0x28] sm:$0xff] }
 0x15c   : > { %325 = vmin.xlane.f32.xlu1 %v324_v29  ;;  %v251_v36 = vpop.xlane.xlu0 %250 }
 0x15d   : > { %v236_v62 = vpop.xlane.xlu1 %235  ;;  %vm339_vm15 = vcmp.lt.s32.totalorder %v331_v28, %v225_v59  ;;  %v252_v10 = vcvt.f32.s32 %v251_v36 }
 0x15e   : > { %v237_v3 = vcvt.f32.s32 %v236_v62  ;;  %v340_v46 = vsel %vm339_vm15, %v331_v28, %v225_v59  ;;  %v479_v28 = vshll.u32 %v478_v47, 16  ;;  %v558_v62 = vld [vmem:[#allocation2 + $0x10] sm:$0xff] }
 0x15f   : > { %356 = vst.msk [vmem:[#allocation4] sm:$0xff] %vm1554_vm7, %v340_v46  ;;  %v255_v49 = vadd.s32 %v254_v38, %v252_v10  ;;  %vm582_vm7 = vcmp.eq.f32.partialorder %v1111_v5, %v558_v62  ;;  %v508_v10 = vcvt.f32.s32 %v1304_v18  ;;  %v559_v18 = vld [vmem:[#allocation2 + $0x18] sm:$0xff] }
 0x160   : > { %v240_v9 = vadd.s32 %v239_v31, %v237_v3  ;;  %v281_v57 = vpop.xlane.xlu0 %280  ;;  %v566_v31 = vld [vmem:[#allocation3 + $0x10] sm:$0xff] }
 0x161   : > { %v266_v50 = vpop.xlane.xlu1 %265  ;;  %vm343_vm11 = vcmp.lt.s32.totalorder %v333_v0, %v255_v49  ;;  %v282_v23 = vcvt.f32.s32 %v281_v57  ;;  %v509_v57 = vshll.u32 %v508_v10, 16 }
 0x162   : > { %vm341_vm4 = vcmp.lt.s32.totalorder %v332_v39, %v240_v9  ;;  %v267_v12 = vcvt.f32.s32 %v266_v50  ;;  %v344_v21 = vsel %vm343_vm11, %v333_v0, %v255_v49 }
 0x163   : > { %v342_v61 = vsel %vm341_vm4, %v332_v39, %v240_v9  ;;  %358 = vst.msk [vmem:[#allocation4 + $0x10] sm:$0xff] %vm1556_vm8, %v344_v21  ;;  %v285_v41 = vadd.s32 %v284_v1, %v282_v23  ;;  %v565_v39 = vld [vmem:[#allocation3 + $0x8] sm:$0xff]  ;;  %vm1560_vm4 = vmmov %vm1559_vm5  ;;  %vm574_vm8 = vcmp.gt.f32.partialorder %v1111_v5, %v558_v62  ;;  %v494_v9 = vshll.u32 %v493_v45, 16 }
 0x164   : > { %357 = vst.msk [vmem:[#allocation4 + $0x8] sm:$0xff] %vm1555_vm14, %v342_v61  ;;  %v270_v26 = vadd.s32 %v269_v8, %v267_v12  ;;  %vm1561_vm11 = vmmov %vm1560_vm4  ;;  %v567_v8 = vld [vmem:[#allocation3 + $0x18] sm:$0xff]  ;;  %v560_v12 = vld [vmem:[#allocation2 + $0x20] sm:$0xff]  ;;  %v523_v1 = vcvt.f32.s32 %v1310_v6 }
 0x165   : > { %v296_v27 = vpop.xlane.xlu1 %295  ;;  %vm347_vm1 = vcmp.lt.s32.totalorder %v335_v7, %v285_v41  ;;  %v1380_v6 = vld [vmem:[#allocation2 + $0x28] sm:$0xff] }
 0x166   : > { %vm345_vm3 = vcmp.lt.s32.totalorder %v334_v51, %v270_v26  ;;  %v297_v55 = vcvt.f32.s32 %v296_v27  ;;  %v348_v40 = vsel %vm347_vm1, %v335_v7, %v285_v41  ;;  %vm581_vm1 = vcmp.eq.f32.partialorder %v1122_v11, %v557_v48  ;;  %v655_v61 = vld [vmem:[#allocation4] sm:$0xff] }
 0x167   : > { %v346_v17 = vsel %vm345_vm3, %v334_v51, %v270_v26  ;;  %360 = vst.msk [vmem:[#allocation4 + $0x20] sm:$0xff] %vm1558_vm13, %v348_v40  ;;  %v568_v26 = vld [vmem:[#allocation3 + $0x20] sm:$0xff]  ;;  %v538_v7 = vcvt.f32.s32 %v1316_v15  ;;  %v553_v40 = vcvt.f32.s32 %v1321_v20 }
 0x168   : > { %359 = vst.msk [vmem:[#allocation4 + $0x18] sm:$0xff] %vm1557_vm12, %v346_v17  ;;  %v300_v43 = vadd.s32 %v299_v34, %v297_v55  ;;  %v524_v34 = vshll.u32 %v523_v1, 16 }
 0x169   : > { %v539_v47 = vshll.u32 %v538_v7, 16 }
 0x16a   : > { %vm349_vm2 = vcmp.lt.s32.totalorder %v336_v32, %v300_v43  ;;  %v657_v55 = vld [vmem:[#allocation4 + $0x10] sm:$0xff] }
 0x16b   : > { %v350_v35 = vsel %vm349_vm2, %v336_v32, %v300_v43  ;;  %vm573_vm2 = vcmp.gt.f32.partialorder %v1122_v11, %v557_v48 }
 0x16c   : > { %361 = vst.msk [vmem:[#allocation4 + $0x28] sm:$0xff] %vm1559_vm5, %v350_v35 }
 0x1cb   : > { %v446_v54 = vpop.xlane.xlu0 %445 }
 0x1cc   : > { %v447_v53 = vcvt.f32.s32 %v446_v54 }
 0x1ce   : > { %v450_v42 = vadd.s32 %v449_v52, %v447_v53  ;;  %v562_v52 = vld [vmem:[#allocation2 + $0x30] sm:$0xff]  ;;  %v313_v53 = vcvt.f32.s32 %v1323_v22 }
 0x1cf   : > { %v476_v29 = vpop.xlane.xlu0 %475  ;;  %v570_v22 = vld [vmem:[#allocation3 + $0x30] sm:$0xff] }
 0x1d0   : > { %vm588_vm6 = vcmp.lt.s32.totalorder %v450_v42, %v564_v60  ;;  %v477_v59 = vcvt.f32.s32 %v476_v29  ;;  %v1412_v29 = vld [vmem:[#allocation2 + $0x38] sm:$0xff] }
 0x1d1   : > { %vm596_vm9 = vmand %vm580_vm0, %vm588_vm6  ;;  %v461_v2 = vpop.xlane.xlu1 %460 }
 0x1d2   : > { %vm604_vm15 = vmor %vm572_vm10, %vm596_vm9  ;;  %v462_v3 = vcvt.f32.s32 %v461_v2  ;;  %v480_v36 = vadd.s32 %v479_v28, %v477_v59  ;;  %vm583_vm9 = vcmp.eq.f32.partialorder %v1134_v14, %v559_v18  ;;  %v328_v28 = vcvt.f32.s32 %v1330_v25 }
 0x1d3   : > { %v612_v38 = vsel %vm604_vm15, %v1105_v4, %v556_v58  ;;  %v628_v56 = vsel %vm604_vm15, %v450_v42, %v564_v60  ;;  %vm1564_vm6 = vmmov %vm1560_vm4  ;;  %v656_v58 = vld [vmem:[#allocation4 + $0x8] sm:$0xff]  ;;  %v659_v4 = vld [vmem:[#allocation4 + $0x20] sm:$0xff] }
 0x1d4   : > { %620 = vst.msk [vmem:[#allocation2] sm:$0xff] %vm1560_vm4, %v612_v38  ;;  %v465_v46 = vadd.s32 %v464_v63, %v462_v3  ;;  %vm590_vm14 = vcmp.lt.s32.totalorder %v480_v36, %v566_v31  ;;  %vm1565_vm10 = vmmov %vm1560_vm4  ;;  %v314_v3 = vshll.u32 %v313_v53, 16  ;;  %v571_v38 = vld [vmem:[#allocation3 + $0x38] sm:$0xff] }
 0x1d5   : > { %636 = vst.msk [vmem:[#allocation3] sm:$0xff] %vm1561_vm11, %v628_v56  ;;  %vm598_vm3 = vmand %vm582_vm7, %vm590_vm14  ;;  %v491_v16 = vpop.xlane.xlu1 %490  ;;  %vm575_vm11 = vcmp.gt.f32.partialorder %v1134_v14, %v559_v18  ;;  %vm576_vm14 = vcmp.gt.f32.partialorder %v1149_v19, %v560_v12 }
 0x1d6   : > { %vm589_vm12 = vcmp.lt.s32.totalorder %v465_v46, %v565_v39  ;;  %vm1358_vm13 = vmor %vm574_vm8, %vm598_vm3  ;;  %v492_v0 = vcvt.f32.s32 %v491_v16  ;;  %vm584_vm8 = vcmp.eq.f32.partialorder %v1149_v19, %v560_v12  ;;  %vm663_vm3 = vcmp.lt.s32.totalorder %v655_v61, 1073741824  ;;  %v337_v16 = vld [vmem:[#allocation4 + $0x30] sm:$0xff] }
 0x1d7   : > { %vm597_vm5 = vmand %vm581_vm1, %vm589_vm12  ;;  %v614_v49 = vsel %vm1358_vm13, %v1111_v5, %v558_v62  ;;  %v630_v50 = vsel %vm1358_vm13, %v480_v36, %v566_v31  ;;  %v506_v13 = vpop.xlane.xlu0 %505  ;;  %v554_v31 = vshll.u32 %v553_v40, 16 }
 0x1d8   : > { %vm605_vm0 = vmor %vm573_vm2, %vm597_vm5  ;;  %622 = vst.msk [vmem:[#allocation2 + $0x10] sm:$0xff] %vm1564_vm6, %v614_v49  ;;  %v495_v51 = vadd.s32 %v494_v9, %v492_v0  ;;  %v507_v23 = vcvt.f32.s32 %v506_v13  ;;  %vm577_vm2 = vcmp.gt.f32.partialorder %v1162_v24, %v1380_v6  ;;  %v329_v9 = vshll.u32 %v328_v28, 16 }
 0x1d9   : > { %638 = vst.msk [vmem:[#allocation3 + $0x10] sm:$0xff] %vm1565_vm10, %v630_v50  ;;  %v613_v5 = vsel %vm605_vm0, %v1122_v11, %v557_v48  ;;  %v629_v21 = vsel %vm605_vm0, %v465_v46, %v565_v39  ;;  %vm1566_vm15 = vmmov %vm1560_vm4 }
 0x1da   : > { %621 = vst.msk [vmem:[#allocation2 + $0x8] sm:$0xff] %vm1566_vm15, %v613_v5  ;;  %vm1567_vm7 = vmmov %vm1560_vm4  ;;  %vm591_vm4 = vcmp.lt.s32.totalorder %v495_v51, %v567_v8  ;;  %v510_v11 = vadd.s32 %v509_v57, %v507_v23  ;;  %v521_v27 = vpop.xlane.xlu1 %520  ;;  %vm585_vm15 = vcmp.eq.f32.partialorder %v1162_v24, %v1380_v6 }
 0x1db   : > { %637 = vst.msk [vmem:[#allocation3 + $0x8] sm:$0xff] %vm1567_vm7, %v629_v21  ;;  %vm599_vm1 = vmand %vm583_vm9, %vm591_vm4  ;;  %v522_v32 = vcvt.f32.s32 %v521_v27  ;;  %vm665_vm7 = vcmp.lt.s32.totalorder %v657_v55, 1073741824 }
 0x1dc   : > { %v647_v41 = vld [vmem:[#allocation3] sm:$0xff]  ;;  %vm1388_vm12 = vmor %vm575_vm11, %vm599_vm1  ;;  %vm592_vm13 = vcmp.lt.s32.totalorder %v510_v11, %v568_v26 }
 0x1dd   : > { %v671_v15 = vsel %vm663_vm3, %v655_v61, %v647_v41  ;;  %vm1570_vm5 = vmmov %vm1564_vm6  ;;  %v615_v43 = vsel %vm1388_vm12, %v1134_v14, %v559_v18  ;;  %v631_v35 = vsel %vm1388_vm12, %v495_v51, %v567_v8  ;;  %v525_v14 = vadd.s32 %v524_v34, %v522_v32  ;;  %v660_v61 = vld [vmem:[#allocation4 + $0x28] sm:$0xff] }
 0x1de   : > { %679 = vst.msk [vmem:[%s1377_s17] sm:$0xff] %vm1570_vm5, %v671_v15  ;;  %vm600_vm0 = vmand %vm584_vm8, %vm592_vm13  ;;  %vm586_vm8 = vcmp.eq.f32.partialorder %v1180_v30, %v562_v52  ;;  %vm664_vm3 = vcmp.lt.s32.totalorder %v656_v58, 1073741824 }
 0x1df   : > { %vm1571_vm6 = vmmov %vm1570_vm5 }
 0x1e0   : > { %v536_v54 = vpop.xlane.xlu0 %535  ;;  %623 = vst.msk [vmem:[#allocation2 + $0x18] sm:$0xff] %vm1571_vm6, %v615_v43  ;;  %vm1572_vm10 = vmmov %vm1570_vm5  ;;  %v649_v60 = vld [vmem:[#allocation3 + $0x10] sm:$0xff] }
 0x1e1   : > { %639 = vst.msk [vmem:[#allocation3 + $0x18] sm:$0xff] %vm1572_vm10, %v631_v35  ;;  %vm608_vm9 = vmor %vm576_vm14, %vm600_vm0  ;;  %v537_v20 = vcvt.f32.s32 %v536_v54  ;;  %v673_v59 = vsel %vm665_vm7, %v657_v55, %v649_v60  ;;  %vm593_vm14 = vcmp.lt.s32.totalorder %v525_v14, %v569_v44  ;;  %vm578_vm0 = vcmp.gt.f32.partialorder %v1180_v30, %v562_v52 }
 0x1e2   : > { %v616_v33 = vsel %vm608_vm9, %v1149_v19, %v560_v12  ;;  %v632_v42 = vsel %vm608_vm9, %v510_v11, %v568_v26  ;;  %vm1573_vm4 = vmmov %vm1570_vm5  ;;  %v658_v19 = vld [vmem:[#allocation4 + $0x18] sm:$0xff]  ;;  %v648_v63 = vld [vmem:[#allocation3 + $0x8] sm:$0xff]  ;;  %vm587_vm10 = vcmp.eq.f32.partialorder %v1199_v37, %v1412_v29 }
 0x1e3   : > { %624 = vst.msk [vmem:[#allocation2 + $0x20] sm:$0xff] %vm1573_vm4, %v616_v33  ;;  %vm1574_vm11 = vmmov %vm1573_vm4  ;;  %v540_v62 = vadd.s32 %v539_v47, %v537_v20  ;;  %v672_v36 = vsel %vm664_vm3, %v656_v58, %v648_v63  ;;  %vm666_vm9 = vcmp.lt.s32.totalorder %v658_v19, 1073741824  ;;  %v338_v12 = vld [vmem:[#allocation4 + $0x38] sm:$0xff] }
 0x1e4   : > { %640 = vst.msk [vmem:[#allocation3 + $0x20] sm:$0xff] %vm1574_vm11, %v632_v42  ;;  %vm1575_vm1 = vmmov %vm1573_vm4  ;;  %v311_v45 = vpop.xlane.xlu0 %310 }
 0x1e5   : > { %v551_v2 = vpop.xlane.xlu1 %550  ;;  %681 = vst.msk [vmem:[%s1377_s17 + $0x10] sm:$0xff] %vm1575_vm1, %v673_v59  ;;  %vm601_vm12 = vmand %vm585_vm15, %vm593_vm14  ;;  %vm594_vm5 = vcmp.lt.s32.totalorder %v540_v62, %v570_v22  ;;  %v312_v56 = vcvt.f32.s32 %v311_v45  ;;  %vm579_vm14 = vcmp.gt.f32.partialorder %v1199_v37, %v1412_v29 }
 0x1e6   : > { %v552_v25 = vcvt.f32.s32 %v551_v2  ;;  %vm1426_vm13 = vmor %vm577_vm2, %vm601_vm12 }
 0x1e7   : > { %vm1578_vm6 = vmmov %vm1575_vm1  ;;  %v617_v39 = vsel %vm1426_vm13, %v1162_v24, %v1380_v6  ;;  %v633_v10 = vsel %vm1426_vm13, %v525_v14, %v569_v44  ;;  %v315_v24 = vadd.s32 %v314_v3, %v312_v56  ;;  %vm667_vm13 = vcmp.lt.s32.totalorder %v659_v4, 1073741824 }
 0x1e8   : > { %680 = vst.msk [vmem:[%s1377_s17 + $0x8] sm:$0xff] %vm1578_vm6, %v672_v36  ;;  %vm602_vm2 = vmand %vm586_vm8, %vm594_vm5  ;;  %v555_v46 = vadd.s32 %v554_v31, %v552_v25  ;;  %v650_v18 = vld [vmem:[#allocation3 + $0x18] sm:$0xff] }
 0x1e9   : > { %vm1579_vm15 = vmmov %vm1575_vm1  ;;  %v326_v0 = vpop.xlane.xlu1 %325  ;;  %v674_v13 = vsel %vm666_vm9, %v658_v19, %v650_v18  ;;  %vm351_vm12 = vcmp.lt.s32.totalorder %v337_v16, %v315_v24 }
 0x1ea   : > { %625 = vst.msk [vmem:[#allocation2 + $0x28] sm:$0xff] %vm1579_vm15, %v617_v39  ;;  %vm1580_vm7 = vmmov %vm1575_vm1  ;;  %vm595_vm11 = vcmp.lt.s32.totalorder %v555_v46, %v571_v38  ;;  %v327_v8 = vcvt.f32.s32 %v326_v0  ;;  %v352_v57 = vsel %vm351_vm12, %v337_v16, %v315_v24 }
 0x1eb   : > { %641 = vst.msk [vmem:[#allocation3 + $0x28] sm:$0xff] %vm1580_vm7, %v633_v10  ;;  %vm610_vm4 = vmor %vm578_vm0, %vm602_vm2  ;;  %vm668_vm7 = vcmp.lt.s32.totalorder %v660_v61, 1073741824 }
 0x1ec   : > { %v618_v49 = vsel %vm610_vm4, %v1180_v30, %v562_v52  ;;  %v634_v50 = vsel %vm610_vm4, %v540_v62, %v570_v22  ;;  %vm1581_vm8 = vmmov %vm1575_vm1  ;;  %v651_v30 = vld [vmem:[#allocation3 + $0x20] sm:$0xff]  ;;  %v330_v1 = vadd.s32 %v329_v9, %v327_v8 }
 0x1ed   : > { %626 = vst.msk [vmem:[#allocation2 + $0x30] sm:$0xff] %vm1581_vm8, %v618_v49  ;;  %vm1582_vm3 = vmmov %vm1575_vm1  ;;  %v675_v51 = vsel %vm667_vm13, %v659_v4, %v651_v30 }
 0x1ee   : > { %642 = vst.msk [vmem:[#allocation3 + $0x30] sm:$0xff] %vm1582_vm3, %v634_v50  ;;  %vm603_vm1 = vmand %vm587_vm10, %vm595_vm11  ;;  %vm353_vm15 = vcmp.lt.s32.totalorder %v338_v12, %v330_v1 }
 0x1ef   : > { %vm1583_vm5 = vmmov %vm1582_vm3  ;;  %v354_v21 = vsel %vm353_vm15, %v338_v12, %v330_v1 }
 0x1f0   : > { %682 = vst.msk [vmem:[%s1377_s17 + $0x18] sm:$0xff] %vm1583_vm5, %v674_v13  ;;  %vm611_vm0 = vmor %vm579_vm14, %vm603_vm1 }
 0x1f1   : > { %v619_v23 = vsel %vm611_vm0, %v1199_v37, %v1412_v29  ;;  %v635_v5 = vsel %vm611_vm0, %v555_v46, %v571_v38  ;;  %vm1584_vm6 = vmmov %vm1582_vm3 }
 0x1f2   : > { %362 = vst.msk [vmem:[#allocation4 + $0x30] sm:$0xff] %vm1584_vm6, %v352_v57  ;;  %vm1585_vm2 = vmmov %vm1582_vm3  ;;  %v652_v26 = vld [vmem:[#allocation3 + $0x28] sm:$0xff] }
 0x1f3   : > { %683 = vst.msk [vmem:[%s1377_s17 + $0x20] sm:$0xff] %vm1585_vm2, %v675_v51  ;;  %vm1586_vm10 = vmmov %vm1585_vm2  ;;  %v676_v6 = vsel %vm668_vm7, %v660_v61, %v652_v26 }
 0x1f4   : > { %627 = vst.msk [vmem:[#allocation2 + $0x38] sm:$0xff] %vm1586_vm10, %v619_v23  ;;  %vm1587_vm9 = vmmov %vm1585_vm2 }
 0x1f5   : > { %643 = vst.msk [vmem:[#allocation3 + $0x38] sm:$0xff] %vm1587_vm9, %v635_v5  ;;  %vm1588_vm4 = vmmov %vm1585_vm2  ;;  %v653_v7 = vld [vmem:[#allocation3 + $0x30] sm:$0xff] }
 0x1f6   : > { %363 = vst.msk [vmem:[#allocation4 + $0x38] sm:$0xff] %vm1588_vm4, %v354_v21  ;;  %vm1589_vm11 = vmmov %vm1585_vm2 }
 0x1f7   : > { %684 = vst.msk [vmem:[%s1377_s17 + $0x28] sm:$0xff] %vm1589_vm11, %v676_v6  ;;  %vm1590_vm8 = vmmov %vm1585_vm2 }
 0x1f8   : > { %vm1591_vm1 = vmmov %vm1585_vm2 }
 0x1f9   : > { %v661_v37 = vld [vmem:[#allocation4 + $0x30] sm:$0xff] }
 0x1fa   : > { %vm669_vm14 = vcmp.lt.s32.totalorder %v661_v37, 1073741824 }
 0x1fb   : > { %v677_v11 = vsel %vm669_vm14, %v661_v37, %v653_v7 }
 0x1fc   : > { %685 = vst.msk [vmem:[%s1377_s17 + $0x30] sm:$0xff] %vm1590_vm8, %v677_v11  ;;  %v654_v27 = vld [vmem:[#allocation3 + $0x38] sm:$0xff] }
 0x1fd   : > { %v662_v41 = vld [vmem:[#allocation4 + $0x38] sm:$0xff] }
 0x1fe   : > { %vm670_vm3 = vcmp.lt.s32.totalorder %v662_v41, 1073741824 }
 0x1ff   : > { %v678_v34 = vsel %vm670_vm3, %v662_v41, %v654_v27 }
 0x200   : > { %686 = vst.msk [vmem:[%s1377_s17 + $0x38] sm:$0xff] %vm1591_vm1, %v678_v34 }
 0x201 PF: > { %s11_s8 = sadd.s32 1, %s815_s8   ;;  %s1592_s6 = smov %s811_s7 }
 0x202   : > { %p8_p5 = scmp.ge.s32.totalorder %s11_s8, 4   ;;  %s1593_s7 = smov %s1595_s9 }
 0x204   :  { %10 = sbr.rel (!%p8_p5) target bundleno = 2 (0x2), region = 62 }

</bundles_post_ra>
